<compile_context>
chip_gen: v7x
topology: tpu7x:2x2x1
jax: 0.10.0
libtpu: 0.0.40
codegen_flags: <defaults>
</compile_context>

<pallas_src>
import jax
import jax.numpy as jnp
import numpy as np
from jax.experimental import pallas as pl
from jax.experimental.pallas import tpu as pltpu


def critic_mlp_kernel(x_ref, w1_ref, b1_ref, w2_ref, b2_ref, w3_ref, b3_ref, o_ref):
    """Fused 3-layer MLP on a transposed (lane-dense) batch tile.

    x_ref : (H, TB)   activations, batch on the lane axis
    w1/w2 : (H, H)    weights in (out_features, in_features) layout
    b1/b2 : (H, 1)    bias columns (broadcast along lanes / batch)
    w3    : (H, 1)    final-layer weight column
    b3    : (1, 1)    final-layer bias
    o_ref : (1, TB)   lane-dense output row for this batch tile
    """
    xt = x_ref[...]

    # Layer 1: h1^T = W1^T @ x^T + b1^T, ReLU   (MXU matmul, f32 accumulate)
    h1 = jnp.dot(w1_ref[...], xt, preferred_element_type=jnp.float32) + b1_ref[...]
    h1 = jnp.maximum(h1, 0.0)

    # Layer 2: h2^T = W2^T @ h1^T + b2^T, ReLU
    h2 = jnp.dot(w2_ref[...], h1, preferred_element_type=jnp.float32) + b2_ref[...]
    h2 = jnp.maximum(h2, 0.0)

    # Layer 3 (out_features = 1): VPU multiply + cross-sublane (XLU) reduce; result
    # is already lane-dense (1, TB) -> single unmasked wide store.
    out = jnp.sum(h2 * w3_ref[...], axis=0, keepdims=True) + b3_ref[...]

    o_ref[...] = out


def _round_up(n, m):
    return pl.cdiv(n, m) * m


def critic_forward(x, params, tb_max=2048):
    """x: (B, H) float32; params: w1,b1,w2,b2 (in,out layout), w3 (H,1), b3 (1,1)."""
    B, H = x.shape

    # Tile size: multiple of 128 (lane width), as large as reasonable (<= tb_max).
    TB = min(tb_max, _round_up(max(B, 1), 128))
    B_pad = _round_up(B, TB)
    num_tiles = B_pad // TB

    # Layout plumbing in the wrapper: transpose + zero-pad batch onto the lane axis.
    xt = jnp.zeros((H, B_pad), x.dtype).at[:, :B].set(x.T)

    # Weights in (out_features, in_features) layout; biases as columns.
    w1t = params["w1"].T
    w2t = params["w2"].T
    b1c = params["b1"].reshape(H, 1)
    b2c = params["b2"].reshape(H, 1)
    w3c = params["w3"].reshape(H, 1)
    b3s = params["b3"].reshape(1, 1)

    const_map = lambda i: (0, 0)

    out = pl.pallas_call(
        critic_mlp_kernel,
        out_shape=jax.ShapeDtypeStruct((1, B_pad), jnp.float32),
        grid_spec=pl.GridSpec(
            grid=(num_tiles,),
            in_specs=[
                pl.BlockSpec((H, TB), lambda i: (0, i)),   # x tile (pipelined over batch)
                pl.BlockSpec((H, H), const_map),           # w1 (resident in VMEM)
                pl.BlockSpec((H, 1), const_map),           # b1
                pl.BlockSpec((H, H), const_map),           # w2
                pl.BlockSpec((H, 1), const_map),           # b2
                pl.BlockSpec((H, 1), const_map),           # w3
                pl.BlockSpec((1, 1), const_map),           # b3
            ],
            out_specs=pl.BlockSpec((1, TB), lambda i: (0, i)),
        ),
        compiler_params=pltpu.CompilerParams(
            dimension_semantics=("parallel",),
        ),
    )(xt, w1t, b1c, w2t, b2c, w3c, b3s)

    return out[0, :B].reshape(B, 1)


def init_critic_params(in_dim, key):
    """Init mimicking PyTorch nn.Linear default (uniform +/- 1/sqrt(fan_in)).

    Weights stored as (in_features, out_features); biases as (1, out_features).
    """
    hidden_dim = 2 * in_dim
    ks = jax.random.split(key, 6)

    def linear(kw, kb, fan_in, fan_out):
        bound = 1.0 / np.sqrt(fan_in)
        w = jax.random.uniform(kw, (fan_in, fan_out), jnp.float32, -bound, bound)
        b = jax.random.uniform(kb, (1, fan_out), jnp.float32, -bound, bound)
        return w, b

    w1, b1 = linear(ks[0], ks[1], hidden_dim, hidden_dim)
    w2, b2 = linear(ks[2], ks[3], hidden_dim, hidden_dim)
    w3, b3 = linear(ks[4], ks[5], hidden_dim, 1)
    return {"w1": w1, "b1": b1, "w2": w2, "b2": b2, "w3": w3, "b3": b3}


def critic_reference(x, params):
    """Pure-JAX reference for correctness check."""
    h = jnp.maximum(x @ params["w1"] + params["b1"], 0.0)
    h = jnp.maximum(h @ params["w2"] + params["b2"], 0.0)
    return h @ params["w3"] + params["b3"]


if __name__ == "__main__":
    key = jax.random.PRNGKey(0)
    k_params, k_x, k_x2 = jax.random.split(key, 3)

    in_dim = 16                  # hidden_dim = 2 * in_dim = 32
    hidden_dim = 2 * in_dim
    batch = 8

    params = init_critic_params(in_dim, k_params)
    # NOTE: the PyTorch module's first Linear expects inputs of size hidden_dim (= 2*in_dim).
    x = jax.random.normal(k_x, (batch, hidden_dim), jnp.float32)

    out = critic_forward(x, params)
    out = jax.block_until_ready(out)
    ref = critic_reference(x, params)
    assert out.shape == (batch, 1)
    np.testing.assert_allclose(np.asarray(out), np.asarray(ref), rtol=1e-5, atol=1e-5)

    # Second check: batch not a multiple of the tile, multi-step grid (TB=128 -> 3 tiles).
    batch2 = 260
    x2 = jax.random.normal(k_x2, (batch2, hidden_dim), jnp.float32)
    out2 = jax.block_until_ready(critic_forward(x2, params, tb_max=128))
    ref2 = critic_reference(x2, params)
    assert out2.shape == (batch2, 1)
    np.testing.assert_allclose(np.asarray(out2), np.asarray(ref2), rtol=1e-5, atol=1e-5)

    print("KERNEL_OK")
</pallas_src>

<mosaic_0001>
module attributes {stable_mosaic.version = 11 : i64} {
  func.func @critic_mlp_kernel(%arg0: i32, %arg1: memref<32x128xf32, #tpu.memory_space<vmem>>, %arg2: memref<32x32xf32, #tpu.memory_space<vmem>>, %arg3: memref<32x1xf32, #tpu.memory_space<vmem>>, %arg4: memref<32x32xf32, #tpu.memory_space<vmem>>, %arg5: memref<32x1xf32, #tpu.memory_space<vmem>>, %arg6: memref<32x1xf32, #tpu.memory_space<vmem>>, %arg7: memref<1x1xf32, #tpu.memory_space<vmem>>, %arg8: memref<1x128xf32, #tpu.memory_space<vmem>>) attributes {dimension_semantics = [#tpu.dimension_semantics<parallel>], iteration_bounds = array<i64: 1>, scalar_prefetch = 0 : i64, scratch_operands = 0 : i64, tpu.core_type = #tpu.core_type<tc>, window_params = [{transform_indices = @transform_0, window_bounds = array<i64: 32, 128>}, {pipeline_mode = #tpu.pipeline_mode<synchronous>, transform_indices = @transform_1, window_bounds = array<i64: 32, 32>}, {pipeline_mode = #tpu.pipeline_mode<synchronous>, transform_indices = @transform_2, window_bounds = array<i64: 32, 1>}, {pipeline_mode = #tpu.pipeline_mode<synchronous>, transform_indices = @transform_3, window_bounds = array<i64: 32, 32>}, {pipeline_mode = #tpu.pipeline_mode<synchronous>, transform_indices = @transform_4, window_bounds = array<i64: 32, 1>}, {pipeline_mode = #tpu.pipeline_mode<synchronous>, transform_indices = @transform_5, window_bounds = array<i64: 32, 1>}, {pipeline_mode = #tpu.pipeline_mode<synchronous>, transform_indices = @transform_6, window_bounds = array<i64: 1, 1>}, {transform_indices = @transform_7, window_bounds = array<i64: 1, 128>}]} {
    %c0 = arith.constant 0 : index
    %c0_0 = arith.constant 0 : index
    %0 = vector.load %arg1[%c0, %c0_0] : memref<32x128xf32, #tpu.memory_space<vmem>>, vector<32x128xf32>
    %c0_1 = arith.constant 0 : index
    %c0_2 = arith.constant 0 : index
    %1 = vector.load %arg2[%c0_1, %c0_2] : memref<32x32xf32, #tpu.memory_space<vmem>>, vector<32x32xf32>
    %cst = arith.constant dense<0.000000e+00> : vector<32x128xf32>
    %2 = tpu.matmul %1, %0, %cst {dimension_numbers = #tpu.dot_dimension_numbers<[1], [0], [0], [1], [0, 0, 1, 1], [], []>} : vector<32x32xf32>, vector<32x128xf32>, vector<32x128xf32> -> vector<32x128xf32>
    %c0_3 = arith.constant 0 : index
    %c0_4 = arith.constant 0 : index
    %3 = vector.load %arg3[%c0_3, %c0_4] : memref<32x1xf32, #tpu.memory_space<vmem>>, vector<32x1xf32>
    %4 = vector.broadcast %3 : vector<32x1xf32> to vector<32x128xf32>
    %5 = arith.addf %2, %4 : vector<32x128xf32>
    %cst_5 = arith.constant 0.000000e+00 : f32
    %6 = vector.broadcast %cst_5 : f32 to vector<32x128xf32>
    %7 = arith.maximumf %5, %6 : vector<32x128xf32>
    %c0_6 = arith.constant 0 : index
    %c0_7 = arith.constant 0 : index
    %8 = vector.load %arg4[%c0_6, %c0_7] : memref<32x32xf32, #tpu.memory_space<vmem>>, vector<32x32xf32>
    %cst_8 = arith.constant dense<0.000000e+00> : vector<32x128xf32>
    %9 = tpu.matmul %8, %7, %cst_8 {dimension_numbers = #tpu.dot_dimension_numbers<[1], [0], [0], [1], [0, 0, 1, 1], [], []>} : vector<32x32xf32>, vector<32x128xf32>, vector<32x128xf32> -> vector<32x128xf32>
    %c0_9 = arith.constant 0 : index
    %c0_10 = arith.constant 0 : index
    %10 = vector.load %arg5[%c0_9, %c0_10] : memref<32x1xf32, #tpu.memory_space<vmem>>, vector<32x1xf32>
    %11 = vector.broadcast %10 : vector<32x1xf32> to vector<32x128xf32>
    %12 = arith.addf %9, %11 : vector<32x128xf32>
    %cst_11 = arith.constant 0.000000e+00 : f32
    %13 = vector.broadcast %cst_11 : f32 to vector<32x128xf32>
    %14 = arith.maximumf %12, %13 : vector<32x128xf32>
    %c0_12 = arith.constant 0 : index
    %c0_13 = arith.constant 0 : index
    %15 = vector.load %arg6[%c0_12, %c0_13] : memref<32x1xf32, #tpu.memory_space<vmem>>, vector<32x1xf32>
    %16 = vector.broadcast %15 : vector<32x1xf32> to vector<32x128xf32>
    %17 = arith.mulf %14, %16 : vector<32x128xf32>
    %cst_14 = arith.constant dense<0.000000e+00> : vector<128xf32>
    %18 = vector.multi_reduction <add>, %17, %cst_14 [0] : vector<32x128xf32> to vector<128xf32>
    %19 = vector.shape_cast %18 : vector<128xf32> to vector<1x128xf32>
    %c0_15 = arith.constant 0 : index
    %c0_16 = arith.constant 0 : index
    %20 = vector.load %arg7[%c0_15, %c0_16] : memref<1x1xf32, #tpu.memory_space<vmem>>, vector<1x1xf32>
    %21 = vector.broadcast %20 : vector<1x1xf32> to vector<1x128xf32>
    %22 = arith.addf %19, %21 : vector<1x128xf32>
    %c0_17 = arith.constant 0 : index
    %c0_18 = arith.constant 0 : index
    %23 = vector.load %arg8[%c0_17, %c0_18] : memref<1x128xf32, #tpu.memory_space<vmem>>, vector<1x128xf32>
    tpu.vector_store %arg8[%c0_17, %c0_18], %22 {strides = array<i32>} : memref<1x128xf32, #tpu.memory_space<vmem>>, vector<1x128xf32>,
    return
  }
  func.func @transform_0(%arg0: i32) -> (i32, i32) {
    %c0_i32 = arith.constant 0 : i32
    %c0_i32_0 = arith.constant 0 : i32
    return %c0_i32, %arg0 : i32, i32
  }
  func.func @transform_1(%arg0: i32) -> (i32, i32) {
    %c0_i32 = arith.constant 0 : i32
    %c0_i32_0 = arith.constant 0 : i32
    %c0_i32_1 = arith.constant 0 : i32
    return %c0_i32, %c0_i32_0 : i32, i32
  }
  func.func @transform_2(%arg0: i32) -> (i32, i32) {
    %c0_i32 = arith.constant 0 : i32
    %c0_i32_0 = arith.constant 0 : i32
    %c0_i32_1 = arith.constant 0 : i32
    return %c0_i32, %c0_i32_0 : i32, i32
  }
  func.func @transform_3(%arg0: i32) -> (i32, i32) {
    %c0_i32 = arith.constant 0 : i32
    %c0_i32_0 = arith.constant 0 : i32
    %c0_i32_1 = arith.constant 0 : i32
    return %c0_i32, %c0_i32_0 : i32, i32
  }
  func.func @transform_4(%arg0: i32) -> (i32, i32) {
    %c0_i32 = arith.constant 0 : i32
    %c0_i32_0 = arith.constant 0 : i32
    %c0_i32_1 = arith.constant 0 : i32
    return %c0_i32, %c0_i32_0 : i32, i32
  }
  func.func @transform_5(%arg0: i32) -> (i32, i32) {
    %c0_i32 = arith.constant 0 : i32
    %c0_i32_0 = arith.constant 0 : i32
    %c0_i32_1 = arith.constant 0 : i32
    return %c0_i32, %c0_i32_0 : i32, i32
  }
  func.func @transform_6(%arg0: i32) -> (i32, i32) {
    %c0_i32 = arith.constant 0 : i32
    %c0_i32_0 = arith.constant 0 : i32
    %c0_i32_1 = arith.constant 0 : i32
    return %c0_i32, %c0_i32_0 : i32, i32
  }
  func.func @transform_7(%arg0: i32) -> (i32, i32) {
    %c0_i32 = arith.constant 0 : i32
    %c0_i32_0 = arith.constant 0 : i32
    return %c0_i32, %arg0 : i32, i32
  }
}

</mosaic_0001>

<bundles_post_ra>
// kernel: tpu_custom_call.1
= control target key start
LH: loop header
LB: loop body
LE: loop exit
PB: predicated region body
PF: predicated region fallthrough
CT: control target
= control target key end

     0   :  { %s588_s0 = inlined_call_operand.vmem [shape: f32[32,128], index: 0, kind: input, shape index: {}]   ;;  %s589_s1 = inlined_call_operand.vmem [shape: f32[32,32], index: 1, kind: input, shape index: {}]   ;;  %s590_s2 = inlined_call_operand.vmem [shape: f32[32,1], index: 2, kind: input, shape index: {}]   ;;  %s591_s3 = inlined_call_operand.vmem [shape: f32[32,32], index: 3, kind: input, shape index: {}]   ;;  %s592_s4 = inlined_call_operand.vmem [shape: f32[32,1], index: 4, kind: input, shape index: {}]   ;;  %s593_s5 = inlined_call_operand.vmem [shape: f32[32,1], index: 5, kind: input, shape index: {}]   ;;  %s594_s6 = inlined_call_operand.<no memory space> [shape: f32[1,1], index: 6, kind: input, shape index: {}]   ;;  %s595_s7 = inlined_call_operand.hbm [shape: f32[1,128], index: 7, kind: output, shape index: {}]  }
   0x1   :  { %v12_v0 = vstv %s594_s6 }
   0x2   :  { %13 = vst [vmem:[#allocation2] sm:$0x1] %v12_v0 }
   0x3   :  { %v29_v1 = vld [vmem:[%s588_s0] sm:$0xff]  ;;  %v30_v2 = vld [vmem:[%s588_s0 + $0x8] sm:$0xff]  ;;  %v31_v3 = vld [vmem:[%s588_s0 + $0x10] sm:$0xff]  ;;  %vm61_vm0 = vcmask 261120   ;;  %v451_v7 = vmov 0  }
   0x4   :  { %v407_v4 = vpack.c.bf16 %v30_v2, %v29_v1  ;;  %v32_v5 = vld [vmem:[%s588_s0 + $0x18] sm:$0xff]  ;;  %v33_v6 = vld [vmem:[%s589_s1] sm:$0xff]  ;;  %425 = vset.pattern.permute.xlu0 %v451_v7  ;;  %426 = vset.pattern.permute.xlu1 %v451_v7  ;;  %v39_v10 = vld [vmem:[%s590_s2 + $0x10] sm:$0xff] }
   0x5   :  { %v411_v8 = vpack.c.bf16 %v32_v5, %v31_v3  ;;  %387 = vmatprep.mubr.msk.f32.mxu0 %vm61_vm0, %v33_v6  ;;  %v37_v9 = vld [vmem:[%s590_s2] sm:$0xff]  ;;  %v38_v11 = vld [vmem:[%s590_s2 + $0x8] sm:$0xff]  ;;  %53 = vperm.xlu1 %426, %v39_v10   ;;  %v40_v12 = vld [vmem:[%s590_s2 + $0x18] sm:$0xff] }
   0x6   :  { %408 = vmatprep.subr.bf16.mxu0 %v407_v4  ;;  %43 = vperm.xlu0 %425, %v37_v9  }
   0x7   :  { %410 = vmatpush3.bf16.msra.mxu0 %v407_v4 }
   0x8   :  { %412 = vmatprep.subr.bf16.mxu0 %v411_v8 }
   0xa   :  { %48 = vperm.xlu0 %425, %v38_v11  }
   0xb   :  { %14 = vsyncpa [#allocation4], 0  ;;  %414 = vmatpush3.bf16.msra.mxu0 %v411_v8  ;;  %v34_v13 = vld [vmem:[%s589_s1 + $0x8] sm:$0xff]  ;;  %v167_v14 = vld [vmem:[%s592_s4] sm:$0xff]  ;;  %58 = vperm.xlu1 %426, %v40_v12   ;;  %v335_v9 = vlaneseq }
   0xc   :  { %v35_v15 = vld [vmem:[%s589_s1 + $0x10] sm:$0xff]  ;;  %v168_v16 = vld [vmem:[%s592_s4 + $0x8] sm:$0xff]  ;;  %v36_v17 = vld [vmem:[%s589_s1 + $0x18] sm:$0xff] }
   0xd   :  { %v169_v18 = vld [vmem:[%s592_s4 + $0x10] sm:$0xff]  ;;  %v170_v19 = vld [vmem:[%s592_s4 + $0x18] sm:$0xff]  ;;  %v292_v20 = vld [vmem:[%s593_s5] sm:$0xff]  ;;  %v336_v12 = vshrl.u32 %v335_v9, 7 }
   0xe   :  { %388 = vmatmul.mubr.msk.f32.vlgmr.msra.gmra.mrb[0].mxu0 %vm61_vm0, %v34_v13  ;;  %173 = vperm.xlu0 %425, %v167_v14   ;;  %v293_v21 = vld [vmem:[%s593_s5 + $0x8] sm:$0xff]  ;;  %v294_v22 = vld [vmem:[%s593_s5 + $0x10] sm:$0xff]  ;;  %v295_v23 = vld [vmem:[%s593_s5 + $0x18] sm:$0xff] }
   0xf   :  { %390 = vmatprep.mubr.msk.f32.mxu0 %vm61_vm0, %v35_v15  ;;  %178 = vperm.xlu1 %426, %v168_v16   ;;  %v329_v24 = vld [vmem:[#allocation2] sm:$0x1]  ;;  %v164_v44 = vld [vmem:[%s591_s3 + $0x8] sm:$0xff]  ;;  %v165_v45 = vld [vmem:[%s591_s3 + $0x10] sm:$0xff]  ;;  %v337_v15 = vsub.s32 0, %v336_v12 }
  0x10   :  { %v163_v25 = vld [vmem:[%s591_s3] sm:$0xff]  ;;  %v166_v46 = vld [vmem:[%s591_s3 + $0x18] sm:$0xff]  ;;  %s452_s3 = smov [#allocation3]  }
  0x11   :  { %401 = vmatprep.mubr.msk.f32.mxu1 %vm61_vm0, %v163_v25  ;;  %s347_s20 = sshll.u32 %s452_s3, 4  ;;  %s348_s20 = int_to_ptr.vmem [resolvable:$true] %s347_s20 }
  0x12   :  { %391 = vmatmul.mubr.msk.f32.gmra.mrb[2].mxu0 %vm61_vm0, %v36_v17  ;;  %183 = vperm.xlu0 %425, %v169_v18   ;;  %s427_s21 = scalar_lea.vmem %s348_s20, 16  ;;  %s431_s22 = scalar_lea.vmem %s348_s20, 32 }
  0x13   :  { %188 = vperm.xlu1 %426, %v170_v19   ;;  %p428_p0 = scmp.ne.s32.totalorder %s348_s20, %s427_s21  ;;  %p432_p1 = scmp.lt.s32.totalorder %s348_s20, %s348_s20 }
  0x14   :  { %p433_p2 = scmp.lt.s32.totalorder %s431_s22, %s427_s21 }
  0x16   :  { %298 = vperm.xlu0 %425, %v292_v20   ;;  %p434_p3 = por %p433_p2, %p432_p1 }
  0x17   :  { %303 = vperm.xlu1 %426, %v293_v21  }
  0x18   :  { %p435_p4 = pnand %p434_p3, %p428_p0 }
  0x1a   :  { %308 = vperm.xlu0 %425, %v294_v22  }
  0x1b   :  { %313 = vperm.xlu1 %426, %v295_v23  }
  0x1e   :  { %332 = vperm.xlu0 %425, %v329_v24  }
  0x84   :  { %v54_v27 = vpop.permute.xlu1 %53 }
  0x85   :  { %v44_v26 = vpop.permute.xlu0 %43 }
  0x89   :  { %v49_v28 = vpop.permute.xlu0 %48 }
  0x8a   :  { %v59_v34 = vpop.permute.xlu1 %58 }
  0x8d   :  { %v174_v47 = vpop.permute.xlu0 %173 }
  0x8e   :  { %v179_v48 = vpop.permute.xlu1 %178 }
  0x91   :  { %v184_v49 = vpop.permute.xlu0 %183 }
  0x92   :  { %v189_v50 = vpop.permute.xlu1 %188 }
  0x95   :  { %v299_v55 = vpop.permute.xlu0 %298 }
  0x96   :  { %v304_v57 = vpop.permute.xlu1 %303 }
  0x99   :  { %v309_v4 = vpop.permute.xlu0 %308 }
  0x9a   :  { %v314_v6 = vpop.permute.xlu1 %313 }
  0x9d   :  { %v333_v17 = vpop.permute.xlu0 %332 }
  0x9e   :  { %v338_v19 = vrot.slane %v333_v17, %v337_v15 }
  0xe1   :  { %v389_v29 = vpop.f32.mrb[0].mxu0 }
  0xe2   :  { %v146_v30 = vadd.f32 %v389_v29, %v49_v28  ;;  %v140_v31 = vpop.f32.mrb[1].mxu0 }
  0xe3   :  { %v141_v32 = vadd.f32 %v140_v31, %v44_v26 }
  0xe4   :  { %v160_v33 = vmax.f32 %v146_v30, 0.0 }
  0xe5   :  { %v159_v35 = vmax.f32 %v141_v32, 0.0  ;;  %v392_v36 = vpop.f32.mrb[2].mxu0 }
  0xe6   :  { %v156_v37 = vadd.f32 %v392_v36, %v59_v34  ;;  %v150_v38 = vpop.f32.mrb[3].mxu0 }
  0xe7   :  { %v151_v39 = vadd.f32 %v150_v38, %v54_v27  ;;  %v415_v40 = vpack.c.bf16 %v160_v33, %v159_v35 }
  0xe8   :  { %v162_v41 = vmax.f32 %v156_v37, 0.0 }
  0xe9   :  { %v161_v42 = vmax.f32 %v151_v39, 0.0  ;;  %416 = vmatprep.subr.bf16.mxu1 %v415_v40 }
  0xea   :  { %418 = vmatpush3.bf16.msra.mxu1 %v415_v40 }
  0xeb   :  { %v419_v43 = vpack.c.bf16 %v162_v41, %v161_v42 }
  0xed   :  { %420 = vmatprep.subr.bf16.mxu1 %v419_v43 }
  0xee   :  { %422 = vmatpush3.bf16.msra.mxu1 %v419_v43 }
  0xf1   :  { %402 = vmatmul.mubr.msk.f32.vlgmr.msra.gmra.mrb[0].mxu1 %vm61_vm0, %v164_v44 }
  0xf2   :  { %404 = vmatprep.mubr.msk.f32.mxu1 %vm61_vm0, %v165_v45 }
  0xf5   :  { %405 = vmatmul.mubr.msk.f32.gmra.mrb[2].mxu1 %vm61_vm0, %v166_v46 }
 0x1c4   :  { %v403_v51 = vpop.f32.mrb[0].mxu1 }
 0x1c5   :  { %v275_v52 = vadd.f32 %v403_v51, %v179_v48  ;;  %v269_v53 = vpop.f32.mrb[1].mxu1 }
 0x1c6   :  { %v270_v54 = vadd.f32 %v269_v53, %v174_v47 }
 0x1c7   :  { %v289_v56 = vmax.f32 %v275_v52, 0.0 }
 0x1c8   :  { %v288_v58 = vmax.f32 %v270_v54, 0.0  ;;  %v406_v59 = vpop.f32.mrb[2].mxu1 }
 0x1c9   :  { %v317_v60 = vmul.f32 %v304_v57, %v289_v56  ;;  %v285_v61 = vadd.f32 %v406_v59, %v189_v50  ;;  %v279_v62 = vpop.f32.mrb[3].mxu1 }
 0x1ca   :  { %v316_v63 = vmul.f32 %v299_v55, %v288_v58  ;;  %v280_v0 = vadd.f32 %v279_v62, %v184_v49 }
 0x1cb   :  { %v291_v2 = vmax.f32 %v285_v61, 0.0 }
 0x1cc   :  { %v320_v1 = vadd.f32 %v317_v60, %v316_v63  ;;  %v290_v3 = vmax.f32 %v280_v0, 0.0 }
 0x1cd   :  { %v319_v7 = vmul.f32 %v314_v6, %v291_v2 }
 0x1ce   :  { %v318_v5 = vmul.f32 %v309_v4, %v290_v3 }
 0x1d0   :  { %v321_v8 = vadd.f32 %v320_v1, %v318_v5 }
 0x1d2   :  { %v322_v10 = vadd.f32 %v321_v8, %v319_v7 }
 0x1d4   :  { %v323_v11 = vrot.slane %v322_v10, 4 }
 0x1d6   :  { %v324_v13 = vadd.f32 %v323_v11, %v322_v10 }
 0x1d8   :  { %v325_v14 = vrot.slane %v324_v13, 2 }
 0x1da   :  { %v326_v16 = vadd.f32 %v325_v14, %v324_v13 }
 0x1dc   :  { %v327_v18 = vrot.slane %v326_v16, 1 }
 0x1de   :  { %v328_v20 = vadd.f32 %v327_v18, %v326_v16 }
 0x1e0   :  { %v339_v21 = vadd.f32 %v338_v19, %v328_v20 }
 0x1e2   :  { %340 = vst [vmem:[#allocation3] sm:$0x1] %v339_v21 }
 0x1e3   :  { %438 = shalt.err (!%p435_p4)
}
 0x1e4   :  { %s439_s25 = scalar_lea.hbm %s595_s7, 16 }
 0x1e5   :  { %p440_p5 = scmp.ne.s32.totalorder %s595_s7, %s439_s25  ;;  %p443_p6 = scmp.lt.u32.totalorder %s439_s25, %s595_s7 }
 0x1e7   :  { %p445_p7 = pnand %p443_p6, %p440_p5 }
 0x1e9   :  { %448 = shalt.err (!%p445_p7)
}
 0x1ea   :  { %350 = dma.vmem_to_hbm [thread:$0]  %s348_s20, 16, %s595_s7, [#allocation4]  }
 0x1eb   :  { %449 = dma.done.wait [#allocation4], 16  }
 0x1ec   :  { %450 = vsyncadd [#allocation4], 4294967280 }
 0x1ed   :  { %354 = vsyncpa [#allocation4], 1 }

</bundles_post_ra>
